<compile_context>
chip_gen: v7x
topology: tpu7x:2x2x1
jax: 0.10.0
libtpu: 0.0.40
codegen_flags: <defaults>
</compile_context>

<pallas_src>
import functools

import jax
import jax.numpy as jnp
from jax.experimental import pallas as pl
from jax.experimental.pallas import tpu as pltpu

# LIFParameters() defaults from norse.torch.functional.lif
TAU_MEM_INV = 1.0 / 1e-2   # 100.0
V_LEAK = 0.0
V_TH = 1.0
V_RESET = 0.0
DT = 0.001

LANES = 512            # lane-dense slab width (multiple of 128)
MAX_TILE_ROWS = 256    # rows per grid step (multiple of 8)
T_BLOCK = 8            # timesteps per grid step (statically unrolled)


def _round_up(x, m):
    return ((x + m - 1) // m) * m


def _spike_latency_kernel(i_ref, o_ref, v_ref, spiked_ref, *,
                          t_block, dt, tau_mem_inv, v_leak, v_th, v_reset):
    """i_ref:      (TILE_ROWS, LANES)            constant input current
       o_ref:      (T_BLOCK, TILE_ROWS, LANES)   first-spike spike train block
       v_ref:      (TILE_ROWS, LANES) VMEM scratch, membrane potential (carried)
       spiked_ref: (TILE_ROWS, LANES) VMEM scratch, "already spiked" mask (carried)
    """
    # Initialize carried state at the first time block of every row tile.
    @pl.when(pl.program_id(1) == 0)
    def _():
        v_ref[...] = jnp.zeros_like(v_ref)
        spiked_ref[...] = jnp.zeros_like(spiked_ref)

    cur = i_ref[...].astype(jnp.float32)

    # Hoisted loop-invariants:  v + dt*tau*((v_leak - v) + cur)
    #                         = v*(1 - dt*tau) + dt*tau*(v_leak + cur)
    alpha = dt * tau_mem_inv
    decay = 1.0 - alpha
    drive = alpha * (v_leak + cur)

    v = v_ref[...]
    spiked = spiked_ref[...]

    # Statically unrolled time loop (t_block <= 8).
    for tt in range(t_block):
        v = v * decay + drive
        z = (v - v_th > 0.0).astype(jnp.float32)     # heaviside, strict >
        first = z * (1.0 - spiked)                   # keep only the first spike
        o_ref[tt] = first.astype(o_ref.dtype)        # wide lane-dense store
        spiked = jnp.maximum(spiked, z)
        v = v - z * (v - v_reset)                    # reset after spike

    v_ref[...] = v
    spiked_ref[...] = spiked


def spike_latency_lif_encode(input_current, seq_length, *, dt=DT,
                             tau_mem_inv=TAU_MEM_INV, v_leak=V_LEAK,
                             v_th=V_TH, v_reset=V_RESET):
    """JAX/Pallas equivalent of norse SpikeLatencyLIFEncoder.forward."""
    orig_shape = tuple(input_current.shape)
    x = input_current.astype(jnp.float32).reshape(-1)
    n = x.shape[0]

    # Lay the flattened input out as a lane-dense (rows, LANES) slab.
    rows = -(-n // LANES)
    tile_rows = min(MAX_TILE_ROWS, _round_up(rows, 8))
    rows_pad = _round_up(max(rows, tile_rows), tile_rows)
    num_row_tiles = rows_pad // tile_rows
    n_pad = rows_pad * LANES
    x2d = jnp.pad(x, (0, n_pad - n)).reshape(rows_pad, LANES)

    # Time blocking: extra (cropped) timesteps are computed if seq_length is
    # not a multiple of t_block — padded neurons/timesteps never affect output.
    t_block = min(T_BLOCK, seq_length)
    num_t_blocks = -(-seq_length // t_block)
    seq_pad = num_t_blocks * t_block

    kernel = functools.partial(
        _spike_latency_kernel,
        t_block=t_block, dt=dt, tau_mem_inv=tau_mem_inv,
        v_leak=v_leak, v_th=v_th, v_reset=v_reset)

    out = pl.pallas_call(
        kernel,
        out_shape=jax.ShapeDtypeStruct((seq_pad, rows_pad, LANES), jnp.float32),
        grid_spec=pltpu.PrefetchScalarGridSpec(
            num_scalar_prefetch=0,
            grid=(num_row_tiles, num_t_blocks),
            in_specs=[pl.BlockSpec((tile_rows, LANES), lambda i, t: (i, 0))],
            out_specs=pl.BlockSpec((t_block, tile_rows, LANES),
                                   lambda i, t: (t, i, 0)),
            scratch_shapes=[pltpu.VMEM((tile_rows, LANES), jnp.float32),   # v
                            pltpu.VMEM((tile_rows, LANES), jnp.float32)],  # spiked
        ),
        compiler_params=pltpu.CompilerParams(
            dimension_semantics=("parallel", "arbitrary"),
            vmem_limit_bytes=48 * 1024 * 1024),
    )(x2d)

    out = out[:seq_length].reshape(seq_length, n_pad)[:, :n]
    return out.reshape((seq_length,) + orig_shape)


def _reference(input_current, seq_length, dt=DT):
    """Pure-JAX reference (same algebraic form as the kernel; identical in
    exact arithmetic to norse's dv = dt*tau*((v_leak - v) + i) update,
    followed by first-spike masking)."""
    cur = input_current.astype(jnp.float32)
    alpha = dt * TAU_MEM_INV
    decay = 1.0 - alpha
    drive = alpha * (V_LEAK + cur)
    v = jnp.zeros_like(cur)
    spiked = jnp.zeros_like(cur)
    outs = []
    for _ in range(seq_length):
        v = v * decay + drive
        z = (v - V_TH > 0.0).astype(jnp.float32)
        outs.append(z * (1.0 - spiked))
        spiked = jnp.maximum(spiked, z)
        v = v - z * (v - V_RESET)
    return jnp.stack(outs, axis=0)


if __name__ == "__main__":
    key = jax.random.PRNGKey(0)
    N, C, H, W = 2, 4, 16, 16
    seq_length = 8
    # Scale so some neurons spike within the window, others don't.
    x = jax.random.uniform(key, (N, C, H, W), dtype=jnp.float32) * 20.0

    out = spike_latency_lif_encode(x, seq_length)
    out = jax.block_until_ready(out)

    ref = _reference(x, seq_length)
    assert out.shape == (seq_length, N, C, H, W), out.shape
    assert out.dtype == jnp.float32
    assert jnp.array_equal(out, ref), "mismatch vs reference"

    print("KERNEL_OK")
</pallas_src>

<mosaic_0001>
module attributes {stable_mosaic.version = 11 : i64} {
  func.func @_spike_latency_kernel(%arg0: i32, %arg1: i32, %arg2: memref<8x512xf32, #tpu.memory_space<vmem>>, %arg3: memref<8x8x512xf32, #tpu.memory_space<vmem>>, %arg4: memref<8x512xf32, #tpu.memory_space<vmem>>, %arg5: memref<8x512xf32, #tpu.memory_space<vmem>>) attributes {dimension_semantics = [#tpu.dimension_semantics<parallel>, #tpu.dimension_semantics<arbitrary>], iteration_bounds = array<i64: 1, 1>, scalar_prefetch = 0 : i64, scratch_operands = 2 : i64, tpu.core_type = #tpu.core_type<tc>, window_params = [{transform_indices = @transform_0, window_bounds = array<i64: 8, 512>}, {transform_indices = @transform_1, window_bounds = array<i64: 8, 8, 512>}]} {
    %c0_i32 = arith.constant 0 : i32
    %0 = arith.cmpi eq, %arg1, %c0_i32 : i32
    %1 = arith.extui %0 : i1 to i32
    %c0_i32_0 = arith.constant 0 : i32
    %2 = arith.cmpi ne, %1, %c0_i32_0 : i32
    scf.if %2 {
      %cst_68 = arith.constant 0.000000e+00 : f32
      %172 = vector.broadcast %cst_68 : f32 to vector<8x512xf32>
      %c0_69 = arith.constant 0 : index
      %c0_70 = arith.constant 0 : index
      %173 = vector.load %arg4[%c0_69, %c0_70] : memref<8x512xf32, #tpu.memory_space<vmem>>, vector<8x512xf32>
      tpu.vector_store %arg4[%c0_69, %c0_70], %172 {strides = array<i32>} : memref<8x512xf32, #tpu.memory_space<vmem>>, vector<8x512xf32>,
      %cst_71 = arith.constant 0.000000e+00 : f32
      %174 = vector.broadcast %cst_71 : f32 to vector<8x512xf32>
      %c0_72 = arith.constant 0 : index
      %c0_73 = arith.constant 0 : index
      %175 = vector.load %arg5[%c0_72, %c0_73] : memref<8x512xf32, #tpu.memory_space<vmem>>, vector<8x512xf32>
      tpu.vector_store %arg5[%c0_72, %c0_73], %174 {strides = array<i32>} : memref<8x512xf32, #tpu.memory_space<vmem>>, vector<8x512xf32>,
    } else {
    }
    %c0 = arith.constant 0 : index
    %c0_1 = arith.constant 0 : index
    %3 = vector.load %arg2[%c0, %c0_1] : memref<8x512xf32, #tpu.memory_space<vmem>>, vector<8x512xf32>
    %cst = arith.constant 0.000000e+00 : f32
    %4 = vector.broadcast %cst : f32 to vector<8x512xf32>
    %5 = arith.addf %4, %3 : vector<8x512xf32>
    %cst_2 = arith.constant 1.000000e-01 : f32
    %6 = vector.broadcast %cst_2 : f32 to vector<8x512xf32>
    %7 = arith.mulf %6, %5 : vector<8x512xf32>
    %c0_3 = arith.constant 0 : index
    %c0_4 = arith.constant 0 : index
    %8 = vector.load %arg4[%c0_3, %c0_4] : memref<8x512xf32, #tpu.memory_space<vmem>>, vector<8x512xf32>
    %c0_5 = arith.constant 0 : index
    %c0_6 = arith.constant 0 : index
    %9 = vector.load %arg5[%c0_5, %c0_6] : memref<8x512xf32, #tpu.memory_space<vmem>>, vector<8x512xf32>
    %cst_7 = arith.constant 0.899999976 : f32
    %10 = vector.broadcast %cst_7 : f32 to vector<8x512xf32>
    %11 = arith.mulf %8, %10 : vector<8x512xf32>
    %12 = arith.addf %11, %7 : vector<8x512xf32>
    %cst_8 = arith.constant 1.000000e+00 : f32
    %13 = vector.broadcast %cst_8 : f32 to vector<8x512xf32>
    %14 = arith.subf %12, %13 : vector<8x512xf32>
    %cst_9 = arith.constant 0.000000e+00 : f32
    %15 = vector.broadcast %cst_9 : f32 to vector<8x512xf32>
    %16 = arith.cmpf ogt, %14, %15 : vector<8x512xf32>
    %17 = arith.extui %16 : vector<8x512xi1> to vector<8x512xi32>
    %18 = arith.sitofp %17 : vector<8x512xi32> to vector<8x512xf32>
    %cst_10 = arith.constant 1.000000e+00 : f32
    %19 = vector.broadcast %cst_10 : f32 to vector<8x512xf32>
    %20 = arith.subf %19, %9 : vector<8x512xf32>
    %21 = arith.mulf %18, %20 : vector<8x512xf32>
    %c0_11 = arith.constant 0 : index
    %c0_12 = arith.constant 0 : index
    %c0_13 = arith.constant 0 : index
    %22 = vector.load %arg3[%c0_11, %c0_12, %c0_13] : memref<8x8x512xf32, #tpu.memory_space<vmem>>, vector<1x8x512xf32>
    %23 = vector.shape_cast %22 : vector<1x8x512xf32> to vector<8x512xf32>
    %24 = vector.shape_cast %21 : vector<8x512xf32> to vector<1x8x512xf32>
    tpu.vector_store %arg3[%c0_11, %c0_12, %c0_13], %24 {strides = array<i32>} : memref<8x8x512xf32, #tpu.memory_space<vmem>>, vector<1x8x512xf32>,
    %25 = arith.maximumf %9, %18 : vector<8x512xf32>
    %cst_14 = arith.constant 0.000000e+00 : f32
    %26 = vector.broadcast %cst_14 : f32 to vector<8x512xf32>
    %27 = arith.subf %12, %26 : vector<8x512xf32>
    %28 = arith.mulf %18, %27 : vector<8x512xf32>
    %29 = arith.subf %12, %28 : vector<8x512xf32>
    %cst_15 = arith.constant 0.899999976 : f32
    %30 = vector.broadcast %cst_15 : f32 to vector<8x512xf32>
    %31 = arith.mulf %29, %30 : vector<8x512xf32>
    %32 = arith.addf %31, %7 : vector<8x512xf32>
    %cst_16 = arith.constant 1.000000e+00 : f32
    %33 = vector.broadcast %cst_16 : f32 to vector<8x512xf32>
    %34 = arith.subf %32, %33 : vector<8x512xf32>
    %cst_17 = arith.constant 0.000000e+00 : f32
    %35 = vector.broadcast %cst_17 : f32 to vector<8x512xf32>
    %36 = arith.cmpf ogt, %34, %35 : vector<8x512xf32>
    %37 = arith.extui %36 : vector<8x512xi1> to vector<8x512xi32>
    %38 = arith.sitofp %37 : vector<8x512xi32> to vector<8x512xf32>
    %cst_18 = arith.constant 1.000000e+00 : f32
    %39 = vector.broadcast %cst_18 : f32 to vector<8x512xf32>
    %40 = arith.subf %39, %25 : vector<8x512xf32>
    %41 = arith.mulf %38, %40 : vector<8x512xf32>
    %c1 = arith.constant 1 : index
    %c0_19 = arith.constant 0 : index
    %c0_20 = arith.constant 0 : index
    %42 = vector.load %arg3[%c1, %c0_19, %c0_20] : memref<8x8x512xf32, #tpu.memory_space<vmem>>, vector<1x8x512xf32>
    %43 = vector.shape_cast %42 : vector<1x8x512xf32> to vector<8x512xf32>
    %44 = vector.shape_cast %41 : vector<8x512xf32> to vector<1x8x512xf32>
    tpu.vector_store %arg3[%c1, %c0_19, %c0_20], %44 {strides = array<i32>} : memref<8x8x512xf32, #tpu.memory_space<vmem>>, vector<1x8x512xf32>,
    %45 = arith.maximumf %25, %38 : vector<8x512xf32>
    %cst_21 = arith.constant 0.000000e+00 : f32
    %46 = vector.broadcast %cst_21 : f32 to vector<8x512xf32>
    %47 = arith.subf %32, %46 : vector<8x512xf32>
    %48 = arith.mulf %38, %47 : vector<8x512xf32>
    %49 = arith.subf %32, %48 : vector<8x512xf32>
    %cst_22 = arith.constant 0.899999976 : f32
    %50 = vector.broadcast %cst_22 : f32 to vector<8x512xf32>
    %51 = arith.mulf %49, %50 : vector<8x512xf32>
    %52 = arith.addf %51, %7 : vector<8x512xf32>
    %cst_23 = arith.constant 1.000000e+00 : f32
    %53 = vector.broadcast %cst_23 : f32 to vector<8x512xf32>
    %54 = arith.subf %52, %53 : vector<8x512xf32>
    %cst_24 = arith.constant 0.000000e+00 : f32
    %55 = vector.broadcast %cst_24 : f32 to vector<8x512xf32>
    %56 = arith.cmpf ogt, %54, %55 : vector<8x512xf32>
    %57 = arith.extui %56 : vector<8x512xi1> to vector<8x512xi32>
    %58 = arith.sitofp %57 : vector<8x512xi32> to vector<8x512xf32>
    %cst_25 = arith.constant 1.000000e+00 : f32
    %59 = vector.broadcast %cst_25 : f32 to vector<8x512xf32>
    %60 = arith.subf %59, %45 : vector<8x512xf32>
    %61 = arith.mulf %58, %60 : vector<8x512xf32>
    %c2 = arith.constant 2 : index
    %c0_26 = arith.constant 0 : index
    %c0_27 = arith.constant 0 : index
    %62 = vector.load %arg3[%c2, %c0_26, %c0_27] : memref<8x8x512xf32, #tpu.memory_space<vmem>>, vector<1x8x512xf32>
    %63 = vector.shape_cast %62 : vector<1x8x512xf32> to vector<8x512xf32>
    %64 = vector.shape_cast %61 : vector<8x512xf32> to vector<1x8x512xf32>
    tpu.vector_store %arg3[%c2, %c0_26, %c0_27], %64 {strides = array<i32>} : memref<8x8x512xf32, #tpu.memory_space<vmem>>, vector<1x8x512xf32>,
    %65 = arith.maximumf %45, %58 : vector<8x512xf32>
    %cst_28 = arith.constant 0.000000e+00 : f32
    %66 = vector.broadcast %cst_28 : f32 to vector<8x512xf32>
    %67 = arith.subf %52, %66 : vector<8x512xf32>
    %68 = arith.mulf %58, %67 : vector<8x512xf32>
    %69 = arith.subf %52, %68 : vector<8x512xf32>
    %cst_29 = arith.constant 0.899999976 : f32
    %70 = vector.broadcast %cst_29 : f32 to vector<8x512xf32>
    %71 = arith.mulf %69, %70 : vector<8x512xf32>
    %72 = arith.addf %71, %7 : vector<8x512xf32>
    %cst_30 = arith.constant 1.000000e+00 : f32
    %73 = vector.broadcast %cst_30 : f32 to vector<8x512xf32>
    %74 = arith.subf %72, %73 : vector<8x512xf32>
    %cst_31 = arith.constant 0.000000e+00 : f32
    %75 = vector.broadcast %cst_31 : f32 to vector<8x512xf32>
    %76 = arith.cmpf ogt, %74, %75 : vector<8x512xf32>
    %77 = arith.extui %76 : vector<8x512xi1> to vector<8x512xi32>
    %78 = arith.sitofp %77 : vector<8x512xi32> to vector<8x512xf32>
    %cst_32 = arith.constant 1.000000e+00 : f32
    %79 = vector.broadcast %cst_32 : f32 to vector<8x512xf32>
    %80 = arith.subf %79, %65 : vector<8x512xf32>
    %81 = arith.mulf %78, %80 : vector<8x512xf32>
    %c3 = arith.constant 3 : index
    %c0_33 = arith.constant 0 : index
    %c0_34 = arith.constant 0 : index
    %82 = vector.load %arg3[%c3, %c0_33, %c0_34] : memref<8x8x512xf32, #tpu.memory_space<vmem>>, vector<1x8x512xf32>
    %83 = vector.shape_cast %82 : vector<1x8x512xf32> to vector<8x512xf32>
    %84 = vector.shape_cast %81 : vector<8x512xf32> to vector<1x8x512xf32>
    tpu.vector_store %arg3[%c3, %c0_33, %c0_34], %84 {strides = array<i32>} : memref<8x8x512xf32, #tpu.memory_space<vmem>>, vector<1x8x512xf32>,
    %85 = arith.maximumf %65, %78 : vector<8x512xf32>
    %cst_35 = arith.constant 0.000000e+00 : f32
    %86 = vector.broadcast %cst_35 : f32 to vector<8x512xf32>
    %87 = arith.subf %72, %86 : vector<8x512xf32>
    %88 = arith.mulf %78, %87 : vector<8x512xf32>
    %89 = arith.subf %72, %88 : vector<8x512xf32>
    %cst_36 = arith.constant 0.899999976 : f32
    %90 = vector.broadcast %cst_36 : f32 to vector<8x512xf32>
    %91 = arith.mulf %89, %90 : vector<8x512xf32>
    %92 = arith.addf %91, %7 : vector<8x512xf32>
    %cst_37 = arith.constant 1.000000e+00 : f32
    %93 = vector.broadcast %cst_37 : f32 to vector<8x512xf32>
    %94 = arith.subf %92, %93 : vector<8x512xf32>
    %cst_38 = arith.constant 0.000000e+00 : f32
    %95 = vector.broadcast %cst_38 : f32 to vector<8x512xf32>
    %96 = arith.cmpf ogt, %94, %95 : vector<8x512xf32>
    %97 = arith.extui %96 : vector<8x512xi1> to vector<8x512xi32>
    %98 = arith.sitofp %97 : vector<8x512xi32> to vector<8x512xf32>
    %cst_39 = arith.constant 1.000000e+00 : f32
    %99 = vector.broadcast %cst_39 : f32 to vector<8x512xf32>
    %100 = arith.subf %99, %85 : vector<8x512xf32>
    %101 = arith.mulf %98, %100 : vector<8x512xf32>
    %c4 = arith.constant 4 : index
    %c0_40 = arith.constant 0 : index
    %c0_41 = arith.constant 0 : index
    %102 = vector.load %arg3[%c4, %c0_40, %c0_41] : memref<8x8x512xf32, #tpu.memory_space<vmem>>, vector<1x8x512xf32>
    %103 = vector.shape_cast %102 : vector<1x8x512xf32> to vector<8x512xf32>
    %104 = vector.shape_cast %101 : vector<8x512xf32> to vector<1x8x512xf32>
    tpu.vector_store %arg3[%c4, %c0_40, %c0_41], %104 {strides = array<i32>} : memref<8x8x512xf32, #tpu.memory_space<vmem>>, vector<1x8x512xf32>,
    %105 = arith.maximumf %85, %98 : vector<8x512xf32>
    %cst_42 = arith.constant 0.000000e+00 : f32
    %106 = vector.broadcast %cst_42 : f32 to vector<8x512xf32>
    %107 = arith.subf %92, %106 : vector<8x512xf32>
    %108 = arith.mulf %98, %107 : vector<8x512xf32>
    %109 = arith.subf %92, %108 : vector<8x512xf32>
    %cst_43 = arith.constant 0.899999976 : f32
    %110 = vector.broadcast %cst_43 : f32 to vector<8x512xf32>
    %111 = arith.mulf %109, %110 : vector<8x512xf32>
    %112 = arith.addf %111, %7 : vector<8x512xf32>
    %cst_44 = arith.constant 1.000000e+00 : f32
    %113 = vector.broadcast %cst_44 : f32 to vector<8x512xf32>
    %114 = arith.subf %112, %113 : vector<8x512xf32>
    %cst_45 = arith.constant 0.000000e+00 : f32
    %115 = vector.broadcast %cst_45 : f32 to vector<8x512xf32>
    %116 = arith.cmpf ogt, %114, %115 : vector<8x512xf32>
    %117 = arith.extui %116 : vector<8x512xi1> to vector<8x512xi32>
    %118 = arith.sitofp %117 : vector<8x512xi32> to vector<8x512xf32>
    %cst_46 = arith.constant 1.000000e+00 : f32
    %119 = vector.broadcast %cst_46 : f32 to vector<8x512xf32>
    %120 = arith.subf %119, %105 : vector<8x512xf32>
    %121 = arith.mulf %118, %120 : vector<8x512xf32>
    %c5 = arith.constant 5 : index
    %c0_47 = arith.constant 0 : index
    %c0_48 = arith.constant 0 : index
    %122 = vector.load %arg3[%c5, %c0_47, %c0_48] : memref<8x8x512xf32, #tpu.memory_space<vmem>>, vector<1x8x512xf32>
    %123 = vector.shape_cast %122 : vector<1x8x512xf32> to vector<8x512xf32>
    %124 = vector.shape_cast %121 : vector<8x512xf32> to vector<1x8x512xf32>
    tpu.vector_store %arg3[%c5, %c0_47, %c0_48], %124 {strides = array<i32>} : memref<8x8x512xf32, #tpu.memory_space<vmem>>, vector<1x8x512xf32>,
    %125 = arith.maximumf %105, %118 : vector<8x512xf32>
    %cst_49 = arith.constant 0.000000e+00 : f32
    %126 = vector.broadcast %cst_49 : f32 to vector<8x512xf32>
    %127 = arith.subf %112, %126 : vector<8x512xf32>
    %128 = arith.mulf %118, %127 : vector<8x512xf32>
    %129 = arith.subf %112, %128 : vector<8x512xf32>
    %cst_50 = arith.constant 0.899999976 : f32
    %130 = vector.broadcast %cst_50 : f32 to vector<8x512xf32>
    %131 = arith.mulf %129, %130 : vector<8x512xf32>
    %132 = arith.addf %131, %7 : vector<8x512xf32>
    %cst_51 = arith.constant 1.000000e+00 : f32
    %133 = vector.broadcast %cst_51 : f32 to vector<8x512xf32>
    %134 = arith.subf %132, %133 : vector<8x512xf32>
    %cst_52 = arith.constant 0.000000e+00 : f32
    %135 = vector.broadcast %cst_52 : f32 to vector<8x512xf32>
    %136 = arith.cmpf ogt, %134, %135 : vector<8x512xf32>
    %137 = arith.extui %136 : vector<8x512xi1> to vector<8x512xi32>
    %138 = arith.sitofp %137 : vector<8x512xi32> to vector<8x512xf32>
    %cst_53 = arith.constant 1.000000e+00 : f32
    %139 = vector.broadcast %cst_53 : f32 to vector<8x512xf32>
    %140 = arith.subf %139, %125 : vector<8x512xf32>
    %141 = arith.mulf %138, %140 : vector<8x512xf32>
    %c6 = arith.constant 6 : index
    %c0_54 = arith.constant 0 : index
    %c0_55 = arith.constant 0 : index
    %142 = vector.load %arg3[%c6, %c0_54, %c0_55] : memref<8x8x512xf32, #tpu.memory_space<vmem>>, vector<1x8x512xf32>
    %143 = vector.shape_cast %142 : vector<1x8x512xf32> to vector<8x512xf32>
    %144 = vector.shape_cast %141 : vector<8x512xf32> to vector<1x8x512xf32>
    tpu.vector_store %arg3[%c6, %c0_54, %c0_55], %144 {strides = array<i32>} : memref<8x8x512xf32, #tpu.memory_space<vmem>>, vector<1x8x512xf32>,
    %145 = arith.maximumf %125, %138 : vector<8x512xf32>
    %cst_56 = arith.constant 0.000000e+00 : f32
    %146 = vector.broadcast %cst_56 : f32 to vector<8x512xf32>
    %147 = arith.subf %132, %146 : vector<8x512xf32>
    %148 = arith.mulf %138, %147 : vector<8x512xf32>
    %149 = arith.subf %132, %148 : vector<8x512xf32>
    %cst_57 = arith.constant 0.899999976 : f32
    %150 = vector.broadcast %cst_57 : f32 to vector<8x512xf32>
    %151 = arith.mulf %149, %150 : vector<8x512xf32>
    %152 = arith.addf %151, %7 : vector<8x512xf32>
    %cst_58 = arith.constant 1.000000e+00 : f32
    %153 = vector.broadcast %cst_58 : f32 to vector<8x512xf32>
    %154 = arith.subf %152, %153 : vector<8x512xf32>
    %cst_59 = arith.constant 0.000000e+00 : f32
    %155 = vector.broadcast %cst_59 : f32 to vector<8x512xf32>
    %156 = arith.cmpf ogt, %154, %155 : vector<8x512xf32>
    %157 = arith.extui %156 : vector<8x512xi1> to vector<8x512xi32>
    %158 = arith.sitofp %157 : vector<8x512xi32> to vector<8x512xf32>
    %cst_60 = arith.constant 1.000000e+00 : f32
    %159 = vector.broadcast %cst_60 : f32 to vector<8x512xf32>
    %160 = arith.subf %159, %145 : vector<8x512xf32>
    %161 = arith.mulf %158, %160 : vector<8x512xf32>
    %c7 = arith.constant 7 : index
    %c0_61 = arith.constant 0 : index
    %c0_62 = arith.constant 0 : index
    %162 = vector.load %arg3[%c7, %c0_61, %c0_62] : memref<8x8x512xf32, #tpu.memory_space<vmem>>, vector<1x8x512xf32>
    %163 = vector.shape_cast %162 : vector<1x8x512xf32> to vector<8x512xf32>
    %164 = vector.shape_cast %161 : vector<8x512xf32> to vector<1x8x512xf32>
    tpu.vector_store %arg3[%c7, %c0_61, %c0_62], %164 {strides = array<i32>} : memref<8x8x512xf32, #tpu.memory_space<vmem>>, vector<1x8x512xf32>,
    %165 = arith.maximumf %145, %158 : vector<8x512xf32>
    %cst_63 = arith.constant 0.000000e+00 : f32
    %166 = vector.broadcast %cst_63 : f32 to vector<8x512xf32>
    %167 = arith.subf %152, %166 : vector<8x512xf32>
    %168 = arith.mulf %158, %167 : vector<8x512xf32>
    %169 = arith.subf %152, %168 : vector<8x512xf32>
    %c0_64 = arith.constant 0 : index
    %c0_65 = arith.constant 0 : index
    %170 = vector.load %arg4[%c0_64, %c0_65] : memref<8x512xf32, #tpu.memory_space<vmem>>, vector<8x512xf32>
    tpu.vector_store %arg4[%c0_64, %c0_65], %169 {strides = array<i32>} : memref<8x512xf32, #tpu.memory_space<vmem>>, vector<8x512xf32>,
    %c0_66 = arith.constant 0 : index
    %c0_67 = arith.constant 0 : index
    %171 = vector.load %arg5[%c0_66, %c0_67] : memref<8x512xf32, #tpu.memory_space<vmem>>, vector<8x512xf32>
    tpu.vector_store %arg5[%c0_66, %c0_67], %165 {strides = array<i32>} : memref<8x512xf32, #tpu.memory_space<vmem>>, vector<8x512xf32>,
    return
  }
  func.func @transform_0(%arg0: i32, %arg1: i32) -> (i32, i32) {
    %c0_i32 = arith.constant 0 : i32
    %c0_i32_0 = arith.constant 0 : i32
    return %arg0, %c0_i32 : i32, i32
  }
  func.func @transform_1(%arg0: i32, %arg1: i32) -> (i32, i32, i32) {
    %c0_i32 = arith.constant 0 : i32
    %c0_i32_0 = arith.constant 0 : i32
    return %arg1, %arg0, %c0_i32 : i32, i32, i32
  }
}

</mosaic_0001>

<bundles_post_ra>
// kernel: tpu_custom_call.1
= control target key start
LH: loop header
LB: loop body
LE: loop exit
PB: predicated region body
PF: predicated region fallthrough
CT: control target
= control target key end

     0   :  { %6 = vsyncpa [#allocation5], 0  ;;  %s715_s0 = inlined_call_operand.hbm [shape: f32[8,512], index: 0, kind: input, shape index: {}]   ;;  %s716_s1 = inlined_call_operand.hbm [shape: f32[8,8,512], index: 1, kind: output, shape index: {}]  }
   0x1   :  { %7 = vsyncpa [#allocation6], 0  ;;  %s586_s6 = smov [#allocation4]   ;;  %s538_s10 = scalar_lea.hbm %s715_s0, 512 }
   0x2   :  { %s14_s7 = sshll.u32 %s586_s6, 4  ;;  %p539_p0 = scmp.ne.s32.totalorder %s715_s0, %s538_s10  ;;  %s15_s7 = int_to_ptr.vmem [resolvable:$true] %s14_s7 }
   0x3   :  { %p542_p1 = scmp.lt.u32.totalorder %s538_s10, %s715_s0 }
   0x5   :  { %p544_p2 = pnand %p542_p1, %p539_p0 }
   0x7   :  { %547 = shalt.err (!%p544_p2)
}
   0x8   :  { %s548_s15 = scalar_lea.vmem %s15_s7, 512  ;;  %p553_p4 = scmp.lt.s32.totalorder %s15_s7, %s15_s7 }
   0x9   :  { %p549_p3 = scmp.ne.s32.totalorder %s15_s7, %s548_s15  ;;  %p554_p5 = scmp.lt.s32.totalorder %s548_s15, %s548_s15 }
   0xb   :  { %p555_p6 = por %p554_p5, %p553_p4 }
   0xd   :  { %p556_p7 = pnand %p555_p6, %p549_p3 }
   0xf   :  { %559 = shalt.err (!%p556_p7)
}
  0x10   :  { %17 = dma.hbm_to_vmem [thread:$0]  %s715_s0, 512, %s15_s7, [#allocation5]  }
  0x11   :  { %582 = dma.done.wait [#allocation5], 512  }
  0x12   :  { %583 = vsyncadd [#allocation5], 4294966784  ;;  %v33_v0 = vld [vmem:[#allocation4] sm:$0xff]  ;;  %v34_v1 = vld [vmem:[#allocation4 + $0x8] sm:$0xff]  ;;  %v587_v12 = vmov 0.0   ;;  %s588_s0 = smov [#allocation7]  }
  0x13   :  { %v35_v2 = vld [vmem:[#allocation4 + $0x10] sm:$0xff]  ;;  %v613_v3 = vmul.f32 0.1, %v33_v0  ;;  %v615_v4 = vmul.f32 0.1, %v34_v1  ;;  %v36_v6 = vld [vmem:[#allocation4 + $0x18] sm:$0xff] }
  0x14   :  { %v617_v5 = vmul.f32 0.1, %v35_v2  ;;  %v622_v10 = vmul.f32 0.1, %v36_v6  ;;  %s457_s18 = sshll.u32 %s588_s0, 4  ;;  %s458_s18 = int_to_ptr.vmem [resolvable:$true] %s457_s18 }
  0x15   :  { %v469_v7 = vadd.f32 -1.0, %v613_v3  ;;  %v470_v8 = vadd.f32 -1.0, %v615_v4  ;;  %s560_s19 = scalar_lea.vmem %s458_s18, 4096  ;;  %p565_p9 = scmp.lt.s32.totalorder %s458_s18, %s458_s18 }
  0x16   :  { %v471_v9 = vadd.f32 -1.0, %v617_v5  ;;  %v472_v11 = vadd.f32 -1.0, %v622_v10  ;;  %p561_p8 = scmp.ne.s32.totalorder %s458_s18, %s560_s19  ;;  %p566_p10 = scmp.lt.s32.totalorder %s560_s19, %s560_s19 }
  0x17   :  { %vm65_vm0 = vcmp.gt.f32.partialorder %v469_v7, 0.0  ;;  %vm66_vm1 = vcmp.gt.f32.partialorder %v470_v8, 0.0 }
  0x18   :  { %vm67_vm2 = vcmp.gt.f32.partialorder %v471_v9, 0.0  ;;  %v473_v13 = vsel %vm65_vm0, 1.0, %v587_v12  ;;  %v474_v14 = vsel %vm66_vm1, 1.0, %v587_v12  ;;  %vm68_vm3 = vcmp.gt.f32.partialorder %v472_v11, 0.0  ;;  %p567_p11 = por %p566_p10, %p565_p9 }
  0x19   :  { %v628_v15 = vsel %vm67_vm2, 1.0, %v587_v12  ;;  %85 = vst [vmem:[#allocation7] sm:$0xff] %v473_v13  ;;  %v93_v16 = vmul.f32 %v473_v13, %v613_v3  ;;  %86 = vst [vmem:[#allocation7 + $0x8] sm:$0xff] %v474_v14  ;;  %v94_v17 = vmul.f32 %v474_v14, %v615_v4  ;;  %v638_v21 = vsel %vm68_vm3, 1.0, %v587_v12 }
  0x1a   :  { %87 = vst [vmem:[#allocation7 + $0x10] sm:$0xff] %v628_v15  ;;  %v95_v18 = vmul.f32 %v628_v15, %v617_v5  ;;  %88 = vst [vmem:[#allocation7 + $0x18] sm:$0xff] %v638_v21  ;;  %v96_v23 = vmul.f32 %v638_v21, %v622_v10  ;;  %v89_v26 = vmax.f32 %v473_v13, 0.0  ;;  %v90_v30 = vmax.f32 %v474_v14, 0.0  ;;  %p568_p12 = pnand %p567_p11, %p561_p8 }
  0x1b   :  { %v97_v19 = vsub.f32 %v613_v3, %v93_v16  ;;  %v98_v20 = vsub.f32 %v615_v4, %v94_v17  ;;  %v91_v32 = vmax.f32 %v628_v15, 0.0  ;;  %v92_v36 = vmax.f32 %v638_v21, 0.0 }
  0x1c   :  { %v99_v22 = vsub.f32 %v617_v5, %v95_v18  ;;  %v100_v28 = vsub.f32 %v622_v10, %v96_v23  ;;  %v125_v35 = vsub.f32 1.0, %v89_v26  ;;  %v126_v39 = vsub.f32 1.0, %v90_v30 }
  0x1d   :  { %v101_v24 = vmul.f32 0.9, %v97_v19  ;;  %v102_v25 = vmul.f32 0.9, %v98_v20  ;;  %v127_v42 = vsub.f32 1.0, %v91_v32  ;;  %v128_v43 = vsub.f32 1.0, %v92_v36 }
  0x1e   :  { %v103_v27 = vmul.f32 0.9, %v99_v22  ;;  %v104_v34 = vmul.f32 0.9, %v100_v28 }
  0x1f   :  { %v105_v29 = vadd.f32 %v101_v24, %v613_v3  ;;  %v106_v31 = vadd.f32 %v102_v25, %v615_v4 }
  0x20   :  { %v107_v33 = vadd.f32 %v103_v27, %v617_v5  ;;  %v108_v40 = vadd.f32 %v104_v34, %v622_v10 }
  0x21   :  { %v477_v37 = vadd.f32 -1.0, %v105_v29  ;;  %v478_v38 = vadd.f32 -1.0, %v106_v31 }
  0x22   :  { %v479_v41 = vadd.f32 -1.0, %v107_v33  ;;  %v480_v46 = vadd.f32 -1.0, %v108_v40 }
  0x23   :  { %vm113_vm4 = vcmp.gt.f32.partialorder %v477_v37, 0.0  ;;  %vm114_vm5 = vcmp.gt.f32.partialorder %v478_v38, 0.0 }
  0x24   :  { %v481_v44 = vsel %vm113_vm4, 1.0, %v587_v12  ;;  %v482_v45 = vsel %vm114_vm5, 1.0, %v587_v12  ;;  %vm115_vm6 = vcmp.gt.f32.partialorder %v479_v41, 0.0  ;;  %vm116_vm7 = vcmp.gt.f32.partialorder %v480_v46, 0.0 }
  0x25   :  { %v129_v47 = vmul.f32 %v481_v44, %v125_v35  ;;  %v142_v48 = vmul.f32 %v481_v44, %v105_v29  ;;  %v130_v49 = vmul.f32 %v482_v45, %v126_v39  ;;  %v143_v50 = vmul.f32 %v482_v45, %v106_v31 }
  0x26   :  { %v483_v51 = vsel %vm115_vm6, 1.0, %v587_v12  ;;  %v484_v56 = vsel %vm116_vm7, 1.0, %v587_v12  ;;  %v138_v62 = vmax.f32 %v89_v26, %v481_v44  ;;  %v139_v63 = vmax.f32 %v90_v30, %v482_v45 }
  0x27   :  { %134 = vst [vmem:[#allocation7 + $0x20] sm:$0xff] %v129_v47  ;;  %v146_v52 = vsub.f32 %v105_v29, %v142_v48  ;;  %135 = vst [vmem:[#allocation7 + $0x28] sm:$0xff] %v130_v49  ;;  %v147_v53 = vsub.f32 %v106_v31, %v143_v50  ;;  %v131_v54 = vmul.f32 %v483_v51, %v127_v42 }
  0x28   :  { %v144_v55 = vmul.f32 %v483_v51, %v107_v33  ;;  %v132_v60 = vmul.f32 %v484_v56, %v128_v43  ;;  %v145_v61 = vmul.f32 %v484_v56, %v108_v40  ;;  %v174_v7 = vsub.f32 1.0, %v138_v62 }
  0x29   :  { %v150_v57 = vmul.f32 0.9, %v146_v52  ;;  %v151_v58 = vmul.f32 0.9, %v147_v53  ;;  %136 = vst [vmem:[#allocation7 + $0x30] sm:$0xff] %v131_v54  ;;  %v175_v8 = vsub.f32 1.0, %v139_v63  ;;  %v140_v13 = vmax.f32 %v91_v32, %v483_v51 }
  0x2a   :  { %v148_v59 = vsub.f32 %v107_v33, %v144_v55  ;;  %137 = vst [vmem:[#allocation7 + $0x38] sm:$0xff] %v132_v60  ;;  %v149_v6 = vsub.f32 %v108_v40, %v145_v61  ;;  %v141_v20 = vmax.f32 %v92_v36, %v484_v56 }
  0x2b   :  { %v154_v1 = vadd.f32 %v150_v57, %v613_v3  ;;  %v155_v2 = vadd.f32 %v151_v58, %v615_v4  ;;  %v176_v17 = vsub.f32 1.0, %v140_v13 }
  0x2c   :  { %v152_v0 = vmul.f32 0.9, %v148_v59  ;;  %v153_v15 = vmul.f32 0.9, %v149_v6  ;;  %v177_v27 = vsub.f32 1.0, %v141_v20 }
  0x2d   :  { %v485_v9 = vadd.f32 -1.0, %v154_v1  ;;  %v486_v11 = vadd.f32 -1.0, %v155_v2 }
  0x2e   :  { %v156_v14 = vadd.f32 %v152_v0, %v617_v5  ;;  %v157_v21 = vadd.f32 %v153_v15, %v622_v10 }
  0x2f   :  { %vm162_vm8 = vcmp.gt.f32.partialorder %v485_v9, 0.0  ;;  %vm163_vm9 = vcmp.gt.f32.partialorder %v486_v11, 0.0 }
  0x30   :  { %v487_v16 = vadd.f32 -1.0, %v156_v14  ;;  %v489_v18 = vsel %vm162_vm8, 1.0, %v587_v12  ;;  %v490_v19 = vsel %vm163_vm9, 1.0, %v587_v12  ;;  %v488_v26 = vadd.f32 -1.0, %v157_v21 }
  0x31   :  { %v178_v22 = vmul.f32 %v489_v18, %v174_v7  ;;  %v191_v23 = vmul.f32 %v489_v18, %v154_v1  ;;  %v179_v24 = vmul.f32 %v490_v19, %v175_v8  ;;  %v192_v25 = vmul.f32 %v490_v19, %v155_v2 }
  0x32   :  { %vm164_vm10 = vcmp.gt.f32.partialorder %v487_v16, 0.0  ;;  %vm165_vm11 = vcmp.gt.f32.partialorder %v488_v26, 0.0  ;;  %v187_v39 = vmax.f32 %v138_v62, %v489_v18  ;;  %v188_v41 = vmax.f32 %v139_v63, %v490_v19 }
  0x33   :  { %183 = vst [vmem:[#allocation7 + $0x40] sm:$0xff] %v178_v22  ;;  %v195_v28 = vsub.f32 %v154_v1, %v191_v23  ;;  %184 = vst [vmem:[#allocation7 + $0x48] sm:$0xff] %v179_v24  ;;  %v196_v29 = vsub.f32 %v155_v2, %v192_v25  ;;  %v491_v30 = vsel %vm164_vm10, 1.0, %v587_v12  ;;  %v492_v35 = vsel %vm165_vm11, 1.0, %v587_v12 }
  0x34   :  { %v180_v31 = vmul.f32 %v491_v30, %v176_v17  ;;  %v193_v32 = vmul.f32 %v491_v30, %v156_v14  ;;  %v181_v37 = vmul.f32 %v492_v35, %v177_v27  ;;  %v194_v38 = vmul.f32 %v492_v35, %v157_v21 }
  0x35   :  { %v199_v33 = vmul.f32 0.9, %v195_v28  ;;  %v200_v34 = vmul.f32 0.9, %v196_v29  ;;  %v223_v45 = vsub.f32 1.0, %v187_v39  ;;  %v224_v48 = vsub.f32 1.0, %v188_v41 }
  0x36   :  { %185 = vst [vmem:[#allocation7 + $0x50] sm:$0xff] %v180_v31  ;;  %v197_v36 = vsub.f32 %v156_v14, %v193_v32  ;;  %186 = vst [vmem:[#allocation7 + $0x58] sm:$0xff] %v181_v37  ;;  %v198_v44 = vsub.f32 %v157_v21, %v194_v38  ;;  %v189_v49 = vmax.f32 %v140_v13, %v491_v30 }
  0x37   :  { %v203_v40 = vadd.f32 %v199_v33, %v613_v3  ;;  %v204_v42 = vadd.f32 %v200_v34, %v615_v4  ;;  %v190_v53 = vmax.f32 %v141_v20, %v492_v35 }
  0x38   :  { %v201_v43 = vmul.f32 0.9, %v197_v36  ;;  %v202_v50 = vmul.f32 0.9, %v198_v44  ;;  %v225_v52 = vsub.f32 1.0, %v189_v49 }
  0x39   :  { %v493_v46 = vadd.f32 -1.0, %v203_v40  ;;  %v494_v47 = vadd.f32 -1.0, %v204_v42  ;;  %v226_v63 = vsub.f32 1.0, %v190_v53 }
  0x3a   :  { %v205_v51 = vadd.f32 %v201_v43, %v617_v5  ;;  %v206_v57 = vadd.f32 %v202_v50, %v622_v10 }
  0x3b   :  { %vm211_vm12 = vcmp.gt.f32.partialorder %v493_v46, 0.0  ;;  %vm212_vm13 = vcmp.gt.f32.partialorder %v494_v47, 0.0 }
  0x3c   :  { %v497_v54 = vsel %vm211_vm12, 1.0, %v587_v12  ;;  %v498_v55 = vsel %vm212_vm13, 1.0, %v587_v12  ;;  %v495_v56 = vadd.f32 -1.0, %v205_v51  ;;  %v496_v62 = vadd.f32 -1.0, %v206_v57 }
  0x3d   :  { %v227_v58 = vmul.f32 %v497_v54, %v223_v45  ;;  %v240_v59 = vmul.f32 %v497_v54, %v203_v40  ;;  %v228_v60 = vmul.f32 %v498_v55, %v224_v48  ;;  %v241_v61 = vmul.f32 %v498_v55, %v204_v42 }
  0x3e   :  { %vm213_vm14 = vcmp.gt.f32.partialorder %v495_v56, 0.0  ;;  %vm214_vm15 = vcmp.gt.f32.partialorder %v496_v62, 0.0  ;;  %v236_v16 = vmax.f32 %v187_v39, %v497_v54  ;;  %v237_v18 = vmax.f32 %v188_v41, %v498_v55 }
  0x3f   :  { %232 = vst [vmem:[#allocation7 + $0x60] sm:$0xff] %v227_v58  ;;  %v244_v0 = vsub.f32 %v203_v40, %v240_v59  ;;  %233 = vst [vmem:[#allocation7 + $0x68] sm:$0xff] %v228_v60  ;;  %v245_v1 = vsub.f32 %v204_v42, %v241_v61  ;;  %v499_v2 = vsel %vm213_vm14, 1.0, %v587_v12  ;;  %v500_v11 = vsel %vm214_vm15, 1.0, %v587_v12 }
  0x40   :  { %v229_v6 = vmul.f32 %v499_v2, %v225_v52  ;;  %v242_v7 = vmul.f32 %v499_v2, %v205_v51  ;;  %v230_v14 = vmul.f32 %v500_v11, %v226_v63  ;;  %v243_v15 = vmul.f32 %v500_v11, %v206_v57 }
  0x41   :  { %v248_v8 = vmul.f32 0.9, %v244_v0  ;;  %v249_v9 = vmul.f32 0.9, %v245_v1  ;;  %v272_v22 = vsub.f32 1.0, %v236_v16  ;;  %v273_v25 = vsub.f32 1.0, %v237_v18 }
  0x42   :  { %234 = vst [vmem:[#allocation7 + $0x70] sm:$0xff] %v229_v6  ;;  %v246_v13 = vsub.f32 %v205_v51, %v242_v7  ;;  %235 = vst [vmem:[#allocation7 + $0x78] sm:$0xff] %v230_v14  ;;  %v247_v21 = vsub.f32 %v206_v57, %v243_v15  ;;  %v238_v26 = vmax.f32 %v189_v49, %v499_v2 }
  0x43   :  { %v252_v17 = vadd.f32 %v248_v8, %v613_v3  ;;  %v253_v19 = vadd.f32 %v249_v9, %v615_v4  ;;  %v239_v30 = vmax.f32 %v190_v53, %v500_v11 }
  0x44   :  { %v250_v20 = vmul.f32 0.9, %v246_v13  ;;  %v251_v27 = vmul.f32 0.9, %v247_v21  ;;  %v274_v29 = vsub.f32 1.0, %v238_v26 }
  0x45   :  { %v501_v23 = vadd.f32 -1.0, %v252_v17  ;;  %v502_v24 = vadd.f32 -1.0, %v253_v19  ;;  %v275_v40 = vsub.f32 1.0, %v239_v30 }
  0x46   :  { %v254_v28 = vadd.f32 %v250_v20, %v617_v5  ;;  %v255_v34 = vadd.f32 %v251_v27, %v622_v10 }
  0x47   :  { %vm260_vm0 = vcmp.gt.f32.partialorder %v501_v23, 0.0  ;;  %vm261_vm1 = vcmp.gt.f32.partialorder %v502_v24, 0.0 }
  0x48   :  { %v505_v31 = vsel %vm260_vm0, 1.0, %v587_v12  ;;  %v506_v32 = vsel %vm261_vm1, 1.0, %v587_v12  ;;  %v503_v33 = vadd.f32 -1.0, %v254_v28  ;;  %v504_v39 = vadd.f32 -1.0, %v255_v34 }
  0x49   :  { %v276_v35 = vmul.f32 %v505_v31, %v272_v22  ;;  %v289_v36 = vmul.f32 %v505_v31, %v252_v17  ;;  %v277_v37 = vmul.f32 %v506_v32, %v273_v25  ;;  %v290_v38 = vmul.f32 %v506_v32, %v253_v19 }
  0x4a   :  { %vm262_vm2 = vcmp.gt.f32.partialorder %v503_v33, 0.0  ;;  %vm263_vm3 = vcmp.gt.f32.partialorder %v504_v39, 0.0  ;;  %v285_v52 = vmax.f32 %v236_v16, %v505_v31  ;;  %v286_v54 = vmax.f32 %v237_v18, %v506_v32 }
  0x4b   :  { %281 = vst [vmem:[#allocation7 + $0x80] sm:$0xff] %v276_v35  ;;  %v293_v41 = vsub.f32 %v252_v17, %v289_v36  ;;  %282 = vst [vmem:[#allocation7 + $0x88] sm:$0xff] %v277_v37  ;;  %v294_v42 = vsub.f32 %v253_v19, %v290_v38  ;;  %v507_v43 = vsel %vm262_vm2, 1.0, %v587_v12  ;;  %v508_v48 = vsel %vm263_vm3, 1.0, %v587_v12 }
  0x4c   :  { %v278_v44 = vmul.f32 %v507_v43, %v274_v29  ;;  %v291_v45 = vmul.f32 %v507_v43, %v254_v28  ;;  %v279_v50 = vmul.f32 %v508_v48, %v275_v40  ;;  %v292_v51 = vmul.f32 %v508_v48, %v255_v34 }
  0x4d   :  { %v297_v46 = vmul.f32 0.9, %v293_v41  ;;  %v298_v47 = vmul.f32 0.9, %v294_v42  ;;  %v321_v58 = vsub.f32 1.0, %v285_v52  ;;  %v322_v61 = vsub.f32 1.0, %v286_v54 }
  0x4e   :  { %283 = vst [vmem:[#allocation7 + $0x90] sm:$0xff] %v278_v44  ;;  %v295_v49 = vsub.f32 %v254_v28, %v291_v45  ;;  %284 = vst [vmem:[#allocation7 + $0x98] sm:$0xff] %v279_v50  ;;  %v296_v57 = vsub.f32 %v255_v34, %v292_v51  ;;  %v287_v62 = vmax.f32 %v238_v26, %v507_v43 }
  0x4f   :  { %v301_v53 = vadd.f32 %v297_v46, %v613_v3  ;;  %v302_v55 = vadd.f32 %v298_v47, %v615_v4  ;;  %v288_v2 = vmax.f32 %v239_v30, %v508_v48 }
  0x50   :  { %v299_v56 = vmul.f32 0.9, %v295_v49  ;;  %v300_v63 = vmul.f32 0.9, %v296_v57  ;;  %v323_v1 = vsub.f32 1.0, %v287_v62 }
  0x51   :  { %v509_v59 = vadd.f32 -1.0, %v301_v53  ;;  %v510_v60 = vadd.f32 -1.0, %v302_v55  ;;  %v324_v17 = vsub.f32 1.0, %v288_v2 }
  0x52   :  { %v303_v0 = vadd.f32 %v299_v56, %v617_v5  ;;  %v304_v9 = vadd.f32 %v300_v63, %v622_v10 }
  0x53   :  { %vm309_vm4 = vcmp.gt.f32.partialorder %v509_v59, 0.0  ;;  %vm310_vm5 = vcmp.gt.f32.partialorder %v510_v60, 0.0 }
  0x54   :  { %v513_v6 = vsel %vm309_vm4, 1.0, %v587_v12  ;;  %v514_v7 = vsel %vm310_vm5, 1.0, %v587_v12  ;;  %v511_v8 = vadd.f32 -1.0, %v303_v0  ;;  %v512_v16 = vadd.f32 -1.0, %v304_v9 }
  0x55   :  { %v325_v11 = vmul.f32 %v513_v6, %v321_v58  ;;  %v338_v13 = vmul.f32 %v513_v6, %v301_v53  ;;  %v326_v14 = vmul.f32 %v514_v7, %v322_v61  ;;  %v339_v15 = vmul.f32 %v514_v7, %v302_v55 }
  0x56   :  { %vm311_vm6 = vcmp.gt.f32.partialorder %v511_v8, 0.0  ;;  %vm312_vm7 = vcmp.gt.f32.partialorder %v512_v16, 0.0  ;;  %v334_v29 = vmax.f32 %v285_v52, %v513_v6  ;;  %v335_v31 = vmax.f32 %v286_v54, %v514_v7 }
  0x57   :  { %330 = vst [vmem:[#allocation7 + $0xa0] sm:$0xff] %v325_v11  ;;  %v342_v18 = vsub.f32 %v301_v53, %v338_v13  ;;  %331 = vst [vmem:[#allocation7 + $0xa8] sm:$0xff] %v326_v14  ;;  %v343_v19 = vsub.f32 %v302_v55, %v339_v15  ;;  %v515_v20 = vsel %vm311_vm6, 1.0, %v587_v12  ;;  %v516_v25 = vsel %vm312_vm7, 1.0, %v587_v12 }
  0x58   :  { %v327_v21 = vmul.f32 %v515_v20, %v323_v1  ;;  %v340_v22 = vmul.f32 %v515_v20, %v303_v0  ;;  %v328_v27 = vmul.f32 %v516_v25, %v324_v17  ;;  %v341_v28 = vmul.f32 %v516_v25, %v304_v9 }
  0x59   :  { %v346_v23 = vmul.f32 0.9, %v342_v18  ;;  %v347_v24 = vmul.f32 0.9, %v343_v19  ;;  %v370_v35 = vsub.f32 1.0, %v334_v29  ;;  %v371_v38 = vsub.f32 1.0, %v335_v31 }
  0x5a   :  { %332 = vst [vmem:[#allocation7 + $0xb0] sm:$0xff] %v327_v21  ;;  %v344_v26 = vsub.f32 %v303_v0, %v340_v22  ;;  %333 = vst [vmem:[#allocation7 + $0xb8] sm:$0xff] %v328_v27  ;;  %v345_v34 = vsub.f32 %v304_v9, %v341_v28  ;;  %v336_v39 = vmax.f32 %v287_v62, %v515_v20 }
  0x5b   :  { %v350_v30 = vadd.f32 %v346_v23, %v613_v3  ;;  %v351_v32 = vadd.f32 %v347_v24, %v615_v4  ;;  %v337_v43 = vmax.f32 %v288_v2, %v516_v25 }
  0x5c   :  { %v348_v33 = vmul.f32 0.9, %v344_v26  ;;  %v349_v40 = vmul.f32 0.9, %v345_v34  ;;  %v372_v42 = vsub.f32 1.0, %v336_v39 }
  0x5d   :  { %v517_v36 = vadd.f32 -1.0, %v350_v30  ;;  %v518_v37 = vadd.f32 -1.0, %v351_v32  ;;  %v373_v53 = vsub.f32 1.0, %v337_v43 }
  0x5e   :  { %v352_v41 = vadd.f32 %v348_v33, %v617_v5  ;;  %v353_v47 = vadd.f32 %v349_v40, %v622_v10 }
  0x5f   :  { %vm358_vm8 = vcmp.gt.f32.partialorder %v517_v36, 0.0  ;;  %vm359_vm9 = vcmp.gt.f32.partialorder %v518_v37, 0.0 }
  0x60   :  { %v521_v44 = vsel %vm358_vm8, 1.0, %v587_v12  ;;  %v522_v45 = vsel %vm359_vm9, 1.0, %v587_v12  ;;  %v519_v46 = vadd.f32 -1.0, %v352_v41  ;;  %v520_v52 = vadd.f32 -1.0, %v353_v47 }
  0x61   :  { %v374_v48 = vmul.f32 %v521_v44, %v370_v35  ;;  %v387_v49 = vmul.f32 %v521_v44, %v350_v30  ;;  %v375_v50 = vmul.f32 %v522_v45, %v371_v38  ;;  %v388_v51 = vmul.f32 %v522_v45, %v351_v32 }
  0x62   :  { %vm360_vm10 = vcmp.gt.f32.partialorder %v519_v46, 0.0  ;;  %vm361_vm11 = vcmp.gt.f32.partialorder %v520_v52, 0.0  ;;  %v383_v59 = vmax.f32 %v334_v29, %v521_v44  ;;  %v384_v62 = vmax.f32 %v335_v31, %v522_v45 }
  0x63   :  { %379 = vst [vmem:[#allocation7 + $0xc0] sm:$0xff] %v374_v48  ;;  %380 = vst [vmem:[#allocation7 + $0xc8] sm:$0xff] %v375_v50  ;;  %v523_v54 = vsel %vm360_vm10, 1.0, %v587_v12  ;;  %v391_v55 = vsub.f32 %v350_v30, %v387_v49  ;;  %v392_v56 = vsub.f32 %v351_v32, %v388_v51  ;;  %v524_v60 = vsel %vm361_vm11, 1.0, %v587_v12 }
  0x64   :  { %v376_v57 = vmul.f32 %v523_v54, %v372_v42  ;;  %v389_v58 = vmul.f32 %v523_v54, %v352_v41  ;;  %v377_v0 = vmul.f32 %v524_v60, %v373_v53  ;;  %v390_v1 = vmul.f32 %v524_v60, %v353_v47 }
  0x65   :  { %v395_v61 = vmul.f32 0.9, %v391_v55  ;;  %v396_v63 = vmul.f32 0.9, %v392_v56  ;;  %v385_v8 = vmax.f32 %v336_v39, %v523_v54  ;;  %v419_v14 = vsub.f32 1.0, %v383_v59 }
  0x66   :  { %381 = vst [vmem:[#allocation7 + $0xd0] sm:$0xff] %v376_v57  ;;  %v393_v2 = vsub.f32 %v352_v41, %v389_v58  ;;  %382 = vst [vmem:[#allocation7 + $0xd8] sm:$0xff] %v377_v0  ;;  %v394_v11 = vsub.f32 %v353_v47, %v390_v1  ;;  %v420_v16 = vsub.f32 1.0, %v384_v62  ;;  %v386_v18 = vmax.f32 %v337_v43, %v524_v60 }
  0x67   :  { %v399_v6 = vadd.f32 %v395_v61, %v613_v3  ;;  %v400_v7 = vadd.f32 %v396_v63, %v615_v4  ;;  %v421_v20 = vsub.f32 1.0, %v385_v8 }
  0x68   :  { %v397_v9 = vmul.f32 0.9, %v393_v2  ;;  %v398_v19 = vmul.f32 0.9, %v394_v11  ;;  %v422_v26 = vsub.f32 1.0, %v386_v18 }
  0x69   :  { %v525_v13 = vadd.f32 -1.0, %v399_v6  ;;  %v526_v15 = vadd.f32 -1.0, %v400_v7 }
  0x6a   :  { %v401_v17 = vadd.f32 %v397_v9, %v617_v5  ;;  %v402_v22 = vadd.f32 %v398_v19, %v622_v10 }
  0x6b   :  { %vm407_vm12 = vcmp.gt.f32.partialorder %v525_v13, 0.0  ;;  %vm408_vm13 = vcmp.gt.f32.partialorder %v526_v15, 0.0 }
  0x6c   :  { %v529_v21 = vsel %vm407_vm12, 1.0, %v587_v12  ;;  %v530_v3 = vsel %vm408_vm13, 1.0, %v587_v12  ;;  %v527_v4 = vadd.f32 -1.0, %v401_v17  ;;  %v528_v25 = vadd.f32 -1.0, %v402_v22 }
  0x6d   :  { %v423_v23 = vmul.f32 %v529_v21, %v419_v14  ;;  %v424_v24 = vmul.f32 %v530_v3, %v420_v16 }
  0x6e   :  { %vm409_vm14 = vcmp.gt.f32.partialorder %v527_v4, 0.0  ;;  %vm410_vm15 = vcmp.gt.f32.partialorder %v528_v25, 0.0 }
  0x6f   :  { %428 = vst [vmem:[#allocation7 + $0xe0] sm:$0xff] %v423_v23  ;;  %429 = vst [vmem:[#allocation7 + $0xe8] sm:$0xff] %v424_v24  ;;  %v531_v5 = vsel %vm409_vm14, 1.0, %v587_v12  ;;  %v532_v28 = vsel %vm410_vm15, 1.0, %v587_v12 }
  0x70   :  { %v425_v27 = vmul.f32 %v531_v5, %v421_v20  ;;  %v426_v29 = vmul.f32 %v532_v28, %v422_v26 }
  0x72   :  { %430 = vst [vmem:[#allocation7 + $0xf0] sm:$0xff] %v425_v27  ;;  %431 = vst [vmem:[#allocation7 + $0xf8] sm:$0xff] %v426_v29 }
  0x73   :  { %571 = shalt.err (!%p568_p12)
}
  0x74   :  { %s572_s22 = scalar_lea.hbm %s716_s1, 4096 }
  0x75   :  { %p573_p13 = scmp.ne.s32.totalorder %s716_s1, %s572_s22  ;;  %p576_p0 = scmp.lt.u32.totalorder %s572_s22, %s716_s1 }
  0x77   :  { %p578_p1 = pnand %p576_p0, %p573_p13 }
  0x79   :  { %581 = shalt.err (!%p578_p1)
}
  0x7a   :  { %s589_s27 = smov 512   ;;  %s590_s28 = smov 32  }
  0x7b   :  { %463 = dma.vmem_to_hbm [thread:$0]  %s458_s18, 4096, %s716_s1, [#allocation6], %s589_s27, %s589_s27, %s590_s28  }
  0x7c   :  { %584 = dma.done.wait [#allocation6], 4096  }
  0x7d   :  { %585 = vsyncadd [#allocation6], 4294963200 }
  0x7e   :  { %467 = vsyncpa [#allocation5], 1 }
  0x7f   :  { %468 = vsyncpa [#allocation6], 1 }

</bundles_post_ra>
